<compile_context>
chip_gen: v6e
topology: v6e:2x2x1
jax: 0.10.0
libtpu: 0.0.40
codegen_flags: <defaults>
</compile_context>

<pallas_src>
import functools

import jax
import jax.numpy as jnp
from jax.experimental import pallas as pl
from jax.experimental.pallas import tpu as pltpu

EPS = 1e-12
_MIB = 1024 * 1024

# Weight blocks at least this large are single-buffered (pl.Buffered(1)) when
# their block index is constant over the grid — double-buffering a
# never-changing multi-MiB block only wastes VMEM. Smaller weights keep the
# default pipelining (the VMEM cost is negligible).
_SINGLE_BUFFER_MIN_BYTES = 4 * _MIB


def _tpu_vmem_capacity_bytes():
    """Physical VMEM per TensorCore (v5e/v6e: 128 MiB, v7x: 64 MiB)."""
    try:
        return int(pltpu.get_tpu_info().vmem_capacity_bytes)
    except Exception:
        return 64 * _MIB  # conservative fallback = smallest (v7x per-TC)


# ---------------------------------------------------------------------------
# Kernels
# ---------------------------------------------------------------------------

def _self_output_resident_kernel(x_ref, res_ref, w_ref, b_ref, g_ref,
                                 beta_ref, o_ref, *, inv_h):
    # Weight fully resident (single K step): no accumulator scratch at all.
    # x_ref: (TM, H), res_ref: (TM, H), w_ref: (H, H) pre-transposed (x @ w),
    # b/g/beta: (1, H) f32.
    y = jnp.dot(x_ref[...], w_ref[...], preferred_element_type=jnp.float32)
    y = y + (res_ref[...].astype(jnp.float32) + b_ref[...])

    # One-sweep LayerNorm statistics: var = E[y^2] - mean^2 (f32, post-residual
    # BERT activations -> numerically fine), then a single fused output pass.
    s1 = jnp.sum(y, axis=-1, keepdims=True)
    s2 = jnp.sum(y * y, axis=-1, keepdims=True)
    mean = s1 * inv_h
    var = s2 * inv_h - mean * mean
    norm = (y - mean) * jax.lax.rsqrt(var + EPS)
    o_ref[...] = (norm * g_ref[...] + beta_ref[...]).astype(o_ref.dtype)


def _self_output_ktiled_kernel(x_ref, res_ref, w_ref, b_ref, g_ref,
                               beta_ref, o_ref, acc_ref, *, inv_h):
    # x_ref: (TM, TK), w_ref: (TK, H), acc_ref: (TM, H) f32 resident across k.
    k = pl.program_id(1)

    @pl.when(k == 0)
    def _():
        # Fold bias + residual into the accumulator init: no zero-fill and no
        # extra (TM,H) adds on the critical final step. The res/bias blocks
        # have k-invariant block indices, so they are only DMA'd once per row
        # tile anyway.
        acc_ref[...] = res_ref[...].astype(jnp.float32) + b_ref[...]

    # Native-dtype MXU matmul, f32 accumulation.
    acc_ref[...] += jnp.dot(x_ref[...], w_ref[...],
                            preferred_element_type=jnp.float32)

    @pl.when(k == pl.num_programs(1) - 1)
    def _():
        y = acc_ref[...]
        s1 = jnp.sum(y, axis=-1, keepdims=True)
        s2 = jnp.sum(y * y, axis=-1, keepdims=True)
        mean = s1 * inv_h
        var = s2 * inv_h - mean * mean
        norm = (y - mean) * jax.lax.rsqrt(var + EPS)
        o_ref[...] = (norm * g_ref[...] + beta_ref[...]).astype(o_ref.dtype)


# ---------------------------------------------------------------------------
# Tiling / VMEM planning (all static, trace-time Python)
# ---------------------------------------------------------------------------

def _plan(rows, H, x_bytes, r_bytes, w_bytes, out_bytes, block_rows):
    cap = _tpu_vmem_capacity_bytes()
    vmem_limit_cap = int(cap * 0.85)          # headroom for compiler scratch
    resident_budget = cap // 2                # weight bytes allowed resident
    kblock_budget = max(8 * _MIB, cap // 5)   # one (tk,H) block, x2 buffers

    w_total = H * H * w_bytes
    single_buffer_w = w_total >= _SINGLE_BUFFER_MIN_BYTES
    n_w_bufs = 1 if single_buffer_w else 2

    # K-tiling requires tk to be a multiple of 128 (it is the lane dim of the
    # x block); otherwise keep the weight resident.
    # TODO(synk): tile the output/hidden dim instead for huge H that is not a
    # multiple of 128 and does not fit resident in VMEM.
    can_ktile = (H % 128 == 0)
    resident = (n_w_bufs * w_total <= resident_budget) or (not can_ktile)

    if resident:
        tk = H
    else:
        tk = (kblock_budget // (2 * H * w_bytes)) // 128 * 128
        tk = max(128, min(tk, H))
        while H % tk != 0:
            tk -= 128            # terminates: 128 always divides H here
        n_w_bufs = 2
        single_buffer_w = False

    # Row tile: default 512 (amortizes weight (re)streaming, saturates the
    # MXU, evens out the 2-TC "parallel" split); multiple of 128 when it does
    # not span all rows.
    if block_rows is None:
        block_rows = 512
    tm = min(block_rows, rows)
    if tm < rows:
        tm = (tm // 128) * 128 if tm >= 128 else max(8, (tm // 8) * 8)

    def est(tm_):
        e = (2 * tm_ * tk * x_bytes           # x blocks (double-buffered)
             + 2 * tm_ * H * r_bytes          # residual blocks
             + 2 * tm_ * H * out_bytes        # output blocks
             + n_w_bufs * tk * H * w_bytes    # weight block(s)
             + 6 * H * 4)                     # bias / gamma / beta (f32)
        if tk < H:
            e += tm_ * H * 4                  # f32 accumulator scratch
        return e

    # Shrink the row tile only if the estimate overflows this chip's VMEM.
    while tm > 128 and est(tm) > vmem_limit_cap:
        tm = max(128, tm // 2)

    vmem_limit = int(min(max(est(tm) * 5 // 4, 32 * _MIB), vmem_limit_cap))
    return tm, tk, single_buffer_w, vmem_limit


# ---------------------------------------------------------------------------
# Public API
# ---------------------------------------------------------------------------

def prepare_params(weight, bias, gamma, beta, compute_dtype=None):
    """One-time parameter preparation (call at setup time, NOT per forward).

    - Transposes the PyTorch Linear weight (out,in) -> (in,out) so the kernel
      computes x @ w_t. Doing this eagerly, outside the jitted forward, means
      the H^2 transpose is materialized in HBM exactly once instead of on
      every invocation (pallas_call is an opaque custom call to XLA).
    - Optionally casts the weight to `compute_dtype` (e.g. jnp.bfloat16) to
      halve weight HBM/VMEM traffic; bias / LN params stay f32.
    """
    w_t = jnp.asarray(weight).T
    if compute_dtype is not None:
        w_t = w_t.astype(compute_dtype)
    b = jnp.asarray(bias, jnp.float32).reshape(1, -1)
    g = jnp.asarray(gamma, jnp.float32).reshape(1, -1)
    bt = jnp.asarray(beta, jnp.float32).reshape(1, -1)
    return w_t, b, g, bt


@functools.partial(jax.jit, static_argnames=("block_rows", "compute_dtype"))
def self_output(hidden_states, input_tensor, w_t, bias_f32, gamma_f32,
                beta_f32, block_rows=None, compute_dtype=None):
    """Fused dense + (eval-mode) dropout + residual + LayerNorm.

    hidden_states / input_tensor: [src_len, batch, hidden].
    w_t / bias_f32 / gamma_f32 / beta_f32: outputs of prepare_params().
    compute_dtype: optionally cast the matmul input to e.g. bf16 (weight must
    have been prepared with the same dtype); changes numerics at ~1e-2 rel.
    """
    S, B, H = hidden_states.shape
    rows = S * B

    x2 = hidden_states.reshape(rows, H)
    if compute_dtype is not None:
        x2 = x2.astype(compute_dtype)
    r2 = input_tensor.reshape(rows, H)

    x_bytes = jnp.dtype(x2.dtype).itemsize
    r_bytes = jnp.dtype(r2.dtype).itemsize
    w_bytes = jnp.dtype(w_t.dtype).itemsize
    out_bytes = jnp.dtype(hidden_states.dtype).itemsize

    tm, tk, single_buffer_w, vmem_limit = _plan(
        rows, H, x_bytes, r_bytes, w_bytes, out_bytes, block_rows)
    inv_h = 1.0 / H

    if tk == H:
        # --- resident-weight path: single K step, no accumulator scratch ----
        w_spec_kwargs = {}
        if single_buffer_w:
            # Block index is constant over the whole grid; single-buffer the
            # large resident weight so it does not cost 2x VMEM.
            w_spec_kwargs = dict(pipeline_mode=pl.Buffered(1))
        out2 = pl.pallas_call(
            functools.partial(_self_output_resident_kernel, inv_h=inv_h),
            out_shape=jax.ShapeDtypeStruct((rows, H), hidden_states.dtype),
            grid_spec=pltpu.PrefetchScalarGridSpec(
                num_scalar_prefetch=0,
                grid=(pl.cdiv(rows, tm),),
                in_specs=[
                    pl.BlockSpec((tm, H), lambda i: (i, 0)),    # x rows
                    pl.BlockSpec((tm, H), lambda i: (i, 0)),    # residual rows
                    pl.BlockSpec((H, H), lambda i: (0, 0),      # weight
                                 **w_spec_kwargs),
                    pl.BlockSpec((1, H), lambda i: (0, 0)),     # bias
                    pl.BlockSpec((1, H), lambda i: (0, 0)),     # gamma
                    pl.BlockSpec((1, H), lambda i: (0, 0)),     # beta
                ],
                out_specs=pl.BlockSpec((tm, H), lambda i: (i, 0)),
            ),
            compiler_params=pltpu.CompilerParams(
                dimension_semantics=("parallel",),
                vmem_limit_bytes=vmem_limit,
            ),
        )(x2, r2, w_t, bias_f32, gamma_f32, beta_f32)
    else:
        # --- K-tiled path: resident f32 accumulator across the k axis -------
        out2 = pl.pallas_call(
            functools.partial(_self_output_ktiled_kernel, inv_h=inv_h),
            out_shape=jax.ShapeDtypeStruct((rows, H), hidden_states.dtype),
            grid_spec=pltpu.PrefetchScalarGridSpec(
                num_scalar_prefetch=0,
                grid=(pl.cdiv(rows, tm), H // tk),
                in_specs=[
                    pl.BlockSpec((tm, tk), lambda i, k: (i, k)),  # x (K-tiled)
                    pl.BlockSpec((tm, H), lambda i, k: (i, 0)),   # residual
                    pl.BlockSpec((tk, H), lambda i, k: (k, 0)),   # weight blk
                    pl.BlockSpec((1, H), lambda i, k: (0, 0)),    # bias
                    pl.BlockSpec((1, H), lambda i, k: (0, 0)),    # gamma
                    pl.BlockSpec((1, H), lambda i, k: (0, 0)),    # beta
                ],
                out_specs=pl.BlockSpec((tm, H), lambda i, k: (i, 0)),
                scratch_shapes=[pltpu.VMEM((tm, H), jnp.float32)],
            ),
            compiler_params=pltpu.CompilerParams(
                dimension_semantics=("parallel", "arbitrary"),
                vmem_limit_bytes=vmem_limit,
            ),
        )(x2, r2, w_t, bias_f32, gamma_f32, beta_f32)

    return out2.reshape(S, B, H)


# ---------------------------------------------------------------------------
# Reference + demo
# ---------------------------------------------------------------------------

def reference(hidden_states, input_tensor, weight, bias, gamma, beta):
    h = jnp.einsum("sbh,oh->sbo", hidden_states, weight) + bias
    y = h + input_tensor
    mean = jnp.mean(y, axis=-1, keepdims=True)
    var = jnp.mean((y - mean) ** 2, axis=-1, keepdims=True)
    return (y - mean) / jnp.sqrt(var + EPS) * gamma + beta


if __name__ == "__main__":
    key = jax.random.PRNGKey(0)
    src_len, batch, hidden = 8, 2, 32   # small demo shapes

    k1, k2, k3, k4 = jax.random.split(key, 4)
    hidden_states = jax.random.normal(k1, (src_len, batch, hidden), jnp.float32)
    input_tensor = jax.random.normal(k2, (src_len, batch, hidden), jnp.float32)

    # Deterministic parameter init (synthetic; mirrors Linear/LayerNorm shapes)
    weight = jax.random.normal(k3, (hidden, hidden), jnp.float32) * 0.02
    bias = jax.random.normal(k4, (hidden,), jnp.float32) * 0.02
    gamma = jnp.ones((hidden,), jnp.float32)
    beta = jnp.zeros((hidden,), jnp.float32)

    # Parameter prep (weight transpose + f32 casts) happens ONCE, eagerly,
    # outside the jitted forward — not re-materialized per call.
    w_t, b_f32, g_f32, beta_f32 = prepare_params(weight, bias, gamma, beta)

    out = self_output(hidden_states, input_tensor, w_t, b_f32, g_f32, beta_f32)
    out = jax.block_until_ready(out)

    ref = reference(hidden_states, input_tensor, weight, bias, gamma, beta)
    assert out.shape == (src_len, batch, hidden)
    assert jnp.allclose(out, ref, atol=1e-5, rtol=1e-5), "mismatch vs reference"

    print("KERNEL_OK")
</pallas_src>

<mosaic_0001>
module attributes {stable_mosaic.version = 11 : i64} {
  func.func @_self_output_resident_kernel(%arg0: i32, %arg1: memref<16x32xf32, #tpu.memory_space<vmem>>, %arg2: memref<16x32xf32, #tpu.memory_space<vmem>>, %arg3: memref<32x32xf32, #tpu.memory_space<vmem>>, %arg4: memref<1x32xf32, #tpu.memory_space<vmem>>, %arg5: memref<1x32xf32, #tpu.memory_space<vmem>>, %arg6: memref<1x32xf32, #tpu.memory_space<vmem>>, %arg7: memref<16x32xf32, #tpu.memory_space<vmem>>) attributes {dimension_semantics = [#tpu.dimension_semantics<parallel>], iteration_bounds = array<i64: 1>, scalar_prefetch = 0 : i64, scratch_operands = 0 : i64, tpu.core_type = #tpu.core_type<tc>, window_params = [{transform_indices = @transform_0, window_bounds = array<i64: 16, 32>}, {transform_indices = @transform_1, window_bounds = array<i64: 16, 32>}, {pipeline_mode = #tpu.pipeline_mode<synchronous>, transform_indices = @transform_2, window_bounds = array<i64: 32, 32>}, {pipeline_mode = #tpu.pipeline_mode<synchronous>, transform_indices = @transform_3, window_bounds = array<i64: 1, 32>}, {pipeline_mode = #tpu.pipeline_mode<synchronous>, transform_indices = @transform_4, window_bounds = array<i64: 1, 32>}, {pipeline_mode = #tpu.pipeline_mode<synchronous>, transform_indices = @transform_5, window_bounds = array<i64: 1, 32>}, {transform_indices = @transform_6, window_bounds = array<i64: 16, 32>}]} {
    %c0 = arith.constant 0 : index
    %c0_0 = arith.constant 0 : index
    %0 = vector.load %arg1[%c0, %c0_0] : memref<16x32xf32, #tpu.memory_space<vmem>>, vector<16x32xf32>
    %c0_1 = arith.constant 0 : index
    %c0_2 = arith.constant 0 : index
    %1 = vector.load %arg3[%c0_1, %c0_2] : memref<32x32xf32, #tpu.memory_space<vmem>>, vector<32x32xf32>
    %cst = arith.constant dense<0.000000e+00> : vector<16x32xf32>
    %2 = tpu.matmul %0, %1, %cst {dimension_numbers = #tpu.dot_dimension_numbers<[1], [0], [0], [1], [0, 0, 1, 1], [], []>} : vector<16x32xf32>, vector<32x32xf32>, vector<16x32xf32> -> vector<16x32xf32>
    %c0_3 = arith.constant 0 : index
    %c0_4 = arith.constant 0 : index
    %3 = vector.load %arg2[%c0_3, %c0_4] : memref<16x32xf32, #tpu.memory_space<vmem>>, vector<16x32xf32>
    %c0_5 = arith.constant 0 : index
    %c0_6 = arith.constant 0 : index
    %4 = vector.load %arg4[%c0_5, %c0_6] : memref<1x32xf32, #tpu.memory_space<vmem>>, vector<1x32xf32>
    %5 = vector.broadcast %4 : vector<1x32xf32> to vector<16x32xf32>
    %6 = arith.addf %3, %5 : vector<16x32xf32>
    %7 = arith.addf %2, %6 : vector<16x32xf32>
    %cst_7 = arith.constant dense<0.000000e+00> : vector<16xf32>
    %8 = vector.multi_reduction <add>, %7, %cst_7 [1] : vector<16x32xf32> to vector<16xf32>
    %9 = vector.shape_cast %8 : vector<16xf32> to vector<16x1xf32>
    %10 = arith.mulf %7, %7 : vector<16x32xf32>
    %cst_8 = arith.constant dense<0.000000e+00> : vector<16xf32>
    %11 = vector.multi_reduction <add>, %10, %cst_8 [1] : vector<16x32xf32> to vector<16xf32>
    %12 = vector.shape_cast %11 : vector<16xf32> to vector<16x1xf32>
    %cst_9 = arith.constant 3.125000e-02 : f32
    %13 = vector.broadcast %cst_9 : f32 to vector<16x1xf32>
    %14 = arith.mulf %9, %13 : vector<16x1xf32>
    %cst_10 = arith.constant 3.125000e-02 : f32
    %15 = vector.broadcast %cst_10 : f32 to vector<16x1xf32>
    %16 = arith.mulf %12, %15 : vector<16x1xf32>
    %17 = arith.mulf %14, %14 : vector<16x1xf32>
    %18 = arith.subf %16, %17 : vector<16x1xf32>
    %19 = vector.broadcast %14 : vector<16x1xf32> to vector<16x32xf32>
    %20 = arith.subf %7, %19 : vector<16x32xf32>
    %cst_11 = arith.constant 9.99999996E-13 : f32
    %21 = vector.broadcast %cst_11 : f32 to vector<16x1xf32>
    %22 = arith.addf %18, %21 : vector<16x1xf32>
    %23 = math.rsqrt %22 : vector<16x1xf32>
    %24 = vector.broadcast %23 : vector<16x1xf32> to vector<16x32xf32>
    %25 = arith.mulf %20, %24 : vector<16x32xf32>
    %c0_12 = arith.constant 0 : index
    %c0_13 = arith.constant 0 : index
    %26 = vector.load %arg5[%c0_12, %c0_13] : memref<1x32xf32, #tpu.memory_space<vmem>>, vector<1x32xf32>
    %27 = vector.broadcast %26 : vector<1x32xf32> to vector<16x32xf32>
    %28 = arith.mulf %25, %27 : vector<16x32xf32>
    %c0_14 = arith.constant 0 : index
    %c0_15 = arith.constant 0 : index
    %29 = vector.load %arg6[%c0_14, %c0_15] : memref<1x32xf32, #tpu.memory_space<vmem>>, vector<1x32xf32>
    %30 = vector.broadcast %29 : vector<1x32xf32> to vector<16x32xf32>
    %31 = arith.addf %28, %30 : vector<16x32xf32>
    %c0_16 = arith.constant 0 : index
    %c0_17 = arith.constant 0 : index
    %32 = vector.load %arg7[%c0_16, %c0_17] : memref<16x32xf32, #tpu.memory_space<vmem>>, vector<16x32xf32>
    tpu.vector_store %arg7[%c0_16, %c0_17], %31 {strides = array<i32>} : memref<16x32xf32, #tpu.memory_space<vmem>>, vector<16x32xf32>,
    return
  }
  func.func @transform_0(%arg0: i32) -> (i32, i32) {
    %c0_i32 = arith.constant 0 : i32
    %c0_i32_0 = arith.constant 0 : i32
    return %arg0, %c0_i32 : i32, i32
  }
  func.func @transform_1(%arg0: i32) -> (i32, i32) {
    %c0_i32 = arith.constant 0 : i32
    %c0_i32_0 = arith.constant 0 : i32
    return %arg0, %c0_i32 : i32, i32
  }
  func.func @transform_2(%arg0: i32) -> (i32, i32) {
    %c0_i32 = arith.constant 0 : i32
    %c0_i32_0 = arith.constant 0 : i32
    %c0_i32_1 = arith.constant 0 : i32
    return %c0_i32, %c0_i32_0 : i32, i32
  }
  func.func @transform_3(%arg0: i32) -> (i32, i32) {
    %c0_i32 = arith.constant 0 : i32
    %c0_i32_0 = arith.constant 0 : i32
    %c0_i32_1 = arith.constant 0 : i32
    return %c0_i32, %c0_i32_0 : i32, i32
  }
  func.func @transform_4(%arg0: i32) -> (i32, i32) {
    %c0_i32 = arith.constant 0 : i32
    %c0_i32_0 = arith.constant 0 : i32
    %c0_i32_1 = arith.constant 0 : i32
    return %c0_i32, %c0_i32_0 : i32, i32
  }
  func.func @transform_5(%arg0: i32) -> (i32, i32) {
    %c0_i32 = arith.constant 0 : i32
    %c0_i32_0 = arith.constant 0 : i32
    %c0_i32_1 = arith.constant 0 : i32
    return %c0_i32, %c0_i32_0 : i32, i32
  }
  func.func @transform_6(%arg0: i32) -> (i32, i32) {
    %c0_i32 = arith.constant 0 : i32
    %c0_i32_0 = arith.constant 0 : i32
    return %arg0, %c0_i32 : i32, i32
  }
}

</mosaic_0001>

<bundles_post_ra>
// kernel: self_output.1
= control target key start
LH: loop header
LB: loop body
LE: loop exit
PB: predicated region body
PF: predicated region fallthrough
CT: control target
= control target key end

     0   :  { %11 = vsyncpa [#allocation3], 0  ;;  %s432_s0 = inlined_call_operand.hbm [shape: f32[16,32], index: 0, kind: input, shape index: {}]   ;;  %s433_s1 = inlined_call_operand.hbm [shape: f32[16,32], index: 1, kind: input, shape index: {}]   ;;  %s434_s2 = inlined_call_operand.hbm [shape: f32[32,32], index: 2, kind: input, shape index: {}]   ;;  %s435_s3 = inlined_call_operand.vmem [shape: f32[1,32], index: 3, kind: input, shape index: {}]   ;;  %s436_s4 = inlined_call_operand.vmem [shape: f32[1,32], index: 4, kind: input, shape index: {}]   ;;  %s437_s5 = inlined_call_operand.vmem [shape: f32[1,32], index: 5, kind: input, shape index: {}]   ;;  %s438_s6 = inlined_call_operand.hbm [shape: f32[16,32], index: 6, kind: output, shape index: {}]  }
   0x1   :  { %12 = vsyncpa [#allocation6], 0 }
   0x2   :  { %13 = vsyncpa [#allocation4], 0  ;;  %s350_s21 = smov [#allocation5]   ;;  %s351_s23 = smov [#allocation2]  }
   0x3   :  { %s31_s22 = sshll.u32 %s350_s21, 4  ;;  %s19_s24 = sshll.u32 %s351_s23, 4  ;;  %s32_s22 = int_to_ptr.vmem [resolvable:$true] %s31_s22  ;;  %s20_s24 = int_to_ptr.vmem [resolvable:$true] %s19_s24 }
   0x4   :  { %s272_s25 = scalar_lea.vmem %s32_s22, 256  ;;  %p277_p1 = scmp.lt.s32.totalorder %s32_s22, %s32_s22 }
   0x5   :  { %p273_p0 = scmp.ne.s32.totalorder %s32_s22, %s272_s25  ;;  %p278_p2 = scmp.lt.s32.totalorder %s272_s25, %s272_s25 }
   0x7   :  { %p279_p3 = por %p278_p2, %p277_p1 }
   0x9   :  { %p280_p4 = pnand %p279_p3, %p273_p0 }
   0xb   :  { %283 = shalt.err (!%p280_p4)
}
   0xc   :  { %s352_s26 = smov 128   ;;  %s353_s27 = smov 8  }
   0xd   :  { %37 = dma.hbm_to_vmem [thread:$0]  %s433_s1, 256, %s32_s22, [#allocation6], %s352_s26, %s352_s26, %s353_s27  }
   0xe   :  { %s292_s30 = scalar_lea.vmem %s20_s24, 256  ;;  %p297_p6 = scmp.lt.s32.totalorder %s20_s24, %s20_s24 }
   0xf   :  { %p293_p5 = scmp.ne.s32.totalorder %s20_s24, %s292_s30  ;;  %p298_p7 = scmp.lt.s32.totalorder %s292_s30, %s292_s30 }
  0x11   :  { %p299_p8 = por %p298_p7, %p297_p6 }
  0x13   :  { %p300_p9 = pnand %p299_p8, %p293_p5 }
  0x15   :  { %303 = shalt.err (!%p300_p9)
}
  0x16   :  { %25 = dma.hbm_to_vmem [thread:$0]  %s432_s0, 256, %s20_s24, [#allocation3], %s352_s26, %s352_s26, %s353_s27  }
  0x17   :  { %s354_s9 = smov [#allocation7]  }
  0x18   :  { %s43_s10 = sshll.u32 %s354_s9, 4  ;;  %s44_s10 = int_to_ptr.vmem [resolvable:$true] %s43_s10 }
  0x19   :  { %s312_s11 = scalar_lea.vmem %s44_s10, 512  ;;  %p317_p11 = scmp.lt.s32.totalorder %s44_s10, %s44_s10 }
  0x1a   :  { %p313_p10 = scmp.ne.s32.totalorder %s44_s10, %s312_s11  ;;  %p318_p12 = scmp.lt.s32.totalorder %s312_s11, %s312_s11 }
  0x1c   :  { %p319_p13 = por %p318_p12, %p317_p11 }
  0x1e   :  { %p320_p0 = pnand %p319_p13, %p313_p10 }
  0x20   :  { %323 = shalt.err (!%p320_p0)
}
  0x21   :  { %49 = dma.hbm_to_vmem [thread:$0]  %s434_s2, 512, %s44_s10, [#allocation6], %s352_s26, %s352_s26, %s353_s27  }
  0x22   :  { %344 = dma.done.wait [#allocation3], 256  }
  0x23   :  { %345 = vsyncadd [#allocation3], 4294967040 }
  0x24   :  { %346 = dma.done.wait [#allocation6], 768  }
  0x25   :  { %347 = vsyncadd [#allocation6], 4294966528  ;;  %vm82_vm0 = vcmask 261120   ;;  %v70_v0 = vld [vmem:[#allocation7 + $0x18] sm:$0xff]  ;;  %v69_v1 = vld [vmem:[#allocation7 + $0x10] sm:$0xff]  ;;  %s355_s16 = smov [#allocation8]  }
  0x26   :  { %243 = vmatprep.subr.mxu0 %v70_v0  ;;  %v65_v2 = vld [vmem:[#allocation2] sm:$0xff]  ;;  %v68_v3 = vld [vmem:[#allocation7 + $0x8] sm:$0xff]  ;;  %v72_v6 = vld [vmem:[#allocation5 + $0x8] sm:$0xff]  ;;  %s219_s17 = sshll.u32 %s355_s16, 4  ;;  %s220_s17 = int_to_ptr.vmem [resolvable:$true] %s219_s17 }
  0x27   :  { %244 = vmatpush3.msra.mxu0 %v70_v0  ;;  %251 = vmatprep.mubr.msk.f32.mxu0 %vm82_vm0, %v65_v2  ;;  %v67_v4 = vld [vmem:[#allocation7] sm:$0xff]  ;;  %v66_v5 = vld [vmem:[#allocation2 + $0x8] sm:$0xff]  ;;  %v71_v8 = vld [vmem:[#allocation5] sm:$0xff]  ;;  %p329_p2 = scmp.lt.s32.totalorder %s220_s17, %s220_s17 }
  0x28   :  { %245 = vmatprep.subr.mxu0 %v69_v1  ;;  %v232_v7 = vld [vmem:[%s435_s3] ss:$0 sm:$0xff] }
  0x29   :  { %246 = vmatpush3.msra.mxu0 %v69_v1  ;;  %v81_v9 = vadd.f32 %v232_v7, %v72_v6  ;;  %v80_v10 = vadd.f32 %v232_v7, %v71_v8  ;;  %v235_v37 = vld [vmem:[%s436_s4] ss:$0 sm:$0xff]  ;;  %s324_s4 = scalar_lea.vmem %s220_s17, 256 }
  0x2a   :  { %247 = vmatprep.subr.mxu0 %v68_v3  ;;  %v236_v39 = vld [vmem:[%s437_s5] ss:$0 sm:$0xff]  ;;  %p325_p1 = scmp.ne.s32.totalorder %s220_s17, %s324_s4  ;;  %p330_p3 = scmp.lt.s32.totalorder %s324_s4, %s324_s4 }
  0x2b   :  { %248 = vmatpush3.msra.mxu0 %v68_v3 }
  0x2c   :  { %249 = vmatprep.subr.mxu0 %v67_v4  ;;  %p331_p4 = por %p330_p3, %p329_p2 }
  0x2d   :  { %250 = vmatpush3.msra.mxu0 %v67_v4 }
  0x2e   :  { %252 = vmatmul.mubr.msk.f32.vlgmr.msra.gmra.mxu0 %vm82_vm0, %v66_v5  ;;  %p332_p5 = pnand %p331_p4, %p325_p1 }
  0xee   :  { %v253_v11 = vpop.f32.mrf.mxu0 }
  0xef   :  { %v161_v13 = vadd.f32 %v253_v11, %v81_v9 }
  0xf0   :  { %v155_v12 = vpop.f32.mrf.mxu0 }
  0xf1   :  { %v156_v14 = vadd.f32 %v155_v12, %v80_v10  ;;  %v171_v18 = vmul.f32 %v161_v13, %v161_v13  ;;  %v167_v19 = vsel %vm82_vm0, %v161_v13, 0.0 }
  0xf3   :  { %v164_v15 = vsel %vm82_vm0, %v156_v14, 0.0  ;;  %v170_v16 = vmul.f32 %v156_v14, %v156_v14  ;;  %v175_v20 = vsel %vm82_vm0, %v171_v18, 0.0 }
  0xf4   :  { %165 = vadd.xlane.f32.xlu0 %v164_v15 }
  0xf5   :  { %v172_v17 = vsel %vm82_vm0, %v170_v16, 0.0 }
  0xf6   :  { %173 = vadd.xlane.f32.xlu1 %v172_v17 }
  0xf8   :  { %168 = vadd.xlane.f32.xlu0 %v167_v19 }
  0xfa   :  { %176 = vadd.xlane.f32.xlu1 %v175_v20 }
 0x17d   :  { %v166_v21 = vpop.xlane.xlu0 %165 }
 0x17e   :  { %v178_v22 = vmul.f32 0.03125, %v166_v21 }
 0x17f   :  { %v174_v23 = vpop.xlane.xlu1 %173 }
 0x180   :  { %v182_v24 = vmul.f32 %v178_v22, %v178_v22  ;;  %v180_v25 = vmul.f32 0.03125, %v174_v23  ;;  %v186_v35 = vsub.f32 %v156_v14, %v178_v22 }
 0x181   :  { %v169_v26 = vpop.xlane.xlu0 %168 }
 0x182   :  { %v184_v27 = vsub.f32 %v180_v25, %v182_v24  ;;  %v179_v28 = vmul.f32 0.03125, %v169_v26 }
 0x183   :  { %v177_v29 = vpop.xlane.xlu1 %176 }
 0x184   :  { %v188_v30 = vadd.f32 1e-12, %v184_v27  ;;  %v183_v31 = vmul.f32 %v179_v28, %v179_v28  ;;  %v181_v32 = vmul.f32 0.03125, %v177_v29  ;;  %v187_v40 = vsub.f32 %v161_v13, %v179_v28 }
 0x186   :  { %260 = vrsqrt.f32 %v188_v30  ;;  %v185_v33 = vsub.f32 %v181_v32, %v183_v31 }
 0x188   :  { %v189_v34 = vadd.f32 1e-12, %v185_v33 }
 0x18a   :  { %262 = vrsqrt.f32 %v189_v34 }
 0x193   :  { %v261_v36 = vpop.eup %260 }
 0x194   :  { %v192_v38 = vmul.f32 %v261_v36, %v186_v35 }
 0x196   :  { %v201_v41 = vmul.f32 %v235_v37, %v192_v38 }
 0x197   :  { %v263_v42 = vpop.eup %262 }
 0x198   :  { %v193_v43 = vmul.f32 %v263_v42, %v187_v40  ;;  %v210_v44 = vadd.f32 %v236_v39, %v201_v41 }
 0x19a   :  { %v202_v45 = vmul.f32 %v235_v37, %v193_v43  ;;  %212 = vst.msk [vmem:[#allocation8] sm:$0xff] %vm82_vm0, %v210_v44 }
 0x19c   :  { %v211_v46 = vadd.f32 %v236_v39, %v202_v45 }
 0x19e   :  { %213 = vst.msk [vmem:[#allocation8 + $0x8] sm:$0xff] %vm82_vm0, %v211_v46 }
 0x19f   :  { %335 = shalt.err (!%p332_p5)
}
 0x1a0   :  { %225 = dma.vmem_to_hbm [thread:$0]  %s220_s17, 256, %s438_s6, [#allocation4], %s352_s26, %s352_s26, %s353_s27  }
 0x1a1   :  { %348 = dma.done.wait [#allocation4], 256  }
 0x1a2   :  { %349 = vsyncadd [#allocation4], 4294967040 }
 0x1a3   :  { %229 = vsyncpa [#allocation3], 1 }
 0x1a4   :  { %230 = vsyncpa [#allocation6], 1 }
 0x1a5   :  { %231 = vsyncpa [#allocation4], 1 }

</bundles_post_ra>
